<compile_context>
chip_gen: v5e
topology: v5e:2x2
jax: 0.10.0
libtpu: 0.0.40
codegen_flags: <defaults>
</compile_context>

<pallas_src>
import math

import jax
import jax.numpy as jnp
from jax.experimental import pallas as pl
from jax.experimental.pallas import tpu as pltpu

# ---------------- small, self-consistent configuration ----------------
B = 2            # batch
T = 8            # decoder sequence length
INPUT_SIZE = 4   # decoder token feature size
H = 8            # num_hiddens
OUT_SIZE = 4     # output_size

LANE = 128                 # TPU lane width
BP = 8                     # batch padded to one sublane tile
IN_PAD = 8                 # x features padded to one sublane tile of W_ix rows
GATE_PAD = 3 * LANE        # gates r | z | n, each in its own 128-lane block
GR, GZ, GN = 0, LANE, 2 * LANE

# 8-row-aligned offsets inside the packed parameter slab (SLAB_ROWS, GATE_PAD).
R_WIX = 0        # W_ih^T rows multiplying X_t      (IN_PAD rows, INPUT_SIZE live)
R_WIC = 8        # W_ih^T rows multiplying context  (H rows)
R_WHH = 16       # W_hh^T                           (H rows)
R_BI = 24        # b_ih (all gates) + b_hh (r,z)    (1 live row)
R_BHN = 32       # b_hn, stored in cols [0:H)       (1 live row)
R_WD = 40        # dense weight^T in cols [0:OUT)   (H rows)
R_BD = 48        # dense bias in cols [0:OUT)       (1 live row)
SLAB_ROWS = 56

OUT_ROWS = T * BP + BP     # head rows + final-hidden rows, single merged output slab


def _seq2seq_decoder_kernel(x_ref, h0_ref, w_ref, out_ref):
    """Whole-batch GRU recurrence + dense head in one invocation.

    x_ref  : (T*BP, IN_PAD)      time-major, sublane-padded decoder inputs
    h0_ref : (BP, H)             initial hidden state (== context, state[-1]), padded
    w_ref  : (SLAB_ROWS, GATE_PAD) packed parameters (one DMA, 8-row / 128-lane aligned)
    out_ref: (OUT_ROWS, LANE)    rows [0,T*BP): head output; rows [T*BP,T*BP+BP): h_T
    """
    x2 = x_ref[...]
    h0 = h0_ref[...]

    wix = w_ref[R_WIX:R_WIX + IN_PAD, :]          # (IN_PAD, GATE_PAD)
    wic = w_ref[R_WIC:R_WIC + H, :]               # (H, GATE_PAD)
    whh = w_ref[R_WHH:R_WHH + H, :]               # (H, GATE_PAD)  VMEM-resident
    b_i = w_ref[R_BI:R_BI + 1, :]                 # (1, GATE_PAD)  b_ih + b_hh[r,z]
    b_hn = w_ref[R_BHN:R_BHN + 1, 0:H]            # (1, H)
    w_d = w_ref[R_WD:R_WD + H, 0:LANE]            # (H, 128)
    b_d = w_ref[R_BD:R_BD + 1, 0:LANE]            # (1, 128)

    # Hoisted, recurrence-independent projections (all biases except b_hn folded in).
    gx = jnp.dot(x2, wix, preferred_element_type=jnp.float32)          # (T*BP, GATE_PAD)
    gc = jnp.dot(h0, wic, preferred_element_type=jnp.float32) + b_i    # (BP, GATE_PAD)
    # Precompute per-step gate preactivations; slices start on 8-sublane boundaries.
    gi_steps = [gx[t * BP:(t + 1) * BP, :] + gc for t in range(T)]

    h = h0                                        # (BP, H)
    hs = []
    for t in range(T):                            # static trip count -> fully unrolled
        gi = gi_steps[t]                                                     # (BP, GATE_PAD)
        gh = jnp.dot(h, whh, preferred_element_type=jnp.float32)            # (BP, GATE_PAD)
        # Gate blocks start at lane-tile boundaries (0 / 128 / 256): no lane shifts.
        r = jax.nn.sigmoid(gi[:, GR:GR + H] + gh[:, GR:GR + H])
        z = jax.nn.sigmoid(gi[:, GZ:GZ + H] + gh[:, GZ:GZ + H])
        n = jnp.tanh(gi[:, GN:GN + H] + r * (gh[:, GN:GN + H] + b_hn))
        h = (1.0 - z) * n + z * h
        hs.append(h)

    h_all = jnp.concatenate(hs, axis=0)           # (T*BP, H), 8-row-aligned concat
    # Lane-dense head matmul + full-width unmasked store of the main output rows.
    out_ref[0:T * BP, :] = (
        jnp.dot(h_all, w_d, preferred_element_type=jnp.float32) + b_d)
    # Final hidden state in the tail rows of the same slab (single output DMA).
    out_ref[T * BP:T * BP + BP, 0:H] = h


def _expand_gates(m):
    """(rows, 3H) gate-packed matrix -> (rows, GATE_PAD) with each gate lane-aligned."""
    m = jnp.asarray(m, jnp.float32)
    out = jnp.zeros((m.shape[0], GATE_PAD), jnp.float32)
    out = out.at[:, GR:GR + H].set(m[:, 0:H])
    out = out.at[:, GZ:GZ + H].set(m[:, H:2 * H])
    out = out.at[:, GN:GN + H].set(m[:, 2 * H:3 * H])
    return out


def _pack_params(p):
    """Pack GRU + dense params into one (SLAB_ROWS, GATE_PAD) slab. Call ONCE at init."""
    wih_t = jnp.asarray(p["w_ih"], jnp.float32).T          # (INPUT_SIZE + H, 3H)
    w_x = wih_t[:INPUT_SIZE]                               # rows multiplying X_t
    w_c = wih_t[INPUT_SIZE:]                               # rows multiplying context
    w_h = jnp.asarray(p["w_hh"], jnp.float32).T            # (H, 3H)
    # Fold b_ih (all gates) + b_hh (r,z only) into one hoisted bias; keep b_hn separate
    # (it must stay inside r * (W_hn h + b_hn) to preserve PyTorch GRU semantics).
    gate_idx = jnp.arange(3 * H)
    b_comb = p["b_ih"] + jnp.where(gate_idx < 2 * H, p["b_hh"], 0.0)
    b_hn = p["b_hh"][2 * H:]

    slab = jnp.zeros((SLAB_ROWS, GATE_PAD), jnp.float32)
    slab = slab.at[R_WIX:R_WIX + INPUT_SIZE].set(_expand_gates(w_x))
    slab = slab.at[R_WIC:R_WIC + H].set(_expand_gates(w_c))
    slab = slab.at[R_WHH:R_WHH + H].set(_expand_gates(w_h))
    slab = slab.at[R_BI:R_BI + 1].set(_expand_gates(b_comb[None, :]))
    slab = slab.at[R_BHN, 0:H].set(b_hn)
    slab = slab.at[R_WD:R_WD + H, 0:OUT_SIZE].set(jnp.asarray(p["w_d"], jnp.float32).T)
    slab = slab.at[R_BD, 0:OUT_SIZE].set(p["b_d"])
    return slab


def _decoder_impl(x, state, slab):
    """x: (B, T, INPUT_SIZE), state: (1, B, H), slab: packed params -> (y, new_state)."""
    # Layout plumbing (fused under jit): time-major, sublane/lane padded inputs.
    x_tm = jnp.transpose(x, (1, 0, 2))                                 # (T, B, INPUT_SIZE)
    x_pad = jnp.zeros((T, BP, IN_PAD), jnp.float32).at[:, :B, :INPUT_SIZE].set(x_tm)
    h0 = jnp.zeros((BP, H), jnp.float32).at[:B, :].set(state[-1])

    vmem = pl.BlockSpec(memory_space=pltpu.MemorySpace.VMEM)
    out_slab = pl.pallas_call(
        _seq2seq_decoder_kernel,
        out_shape=jax.ShapeDtypeStruct((OUT_ROWS, LANE), jnp.float32),
        in_specs=[vmem, vmem, vmem],
        out_specs=vmem,
    )(x_pad.reshape(T * BP, IN_PAD), h0, slab)

    y = (out_slab[:T * BP, :OUT_SIZE]
         .reshape(T, BP, OUT_SIZE)[:, :B, :]
         .transpose(1, 0, 2))                                          # (B, T, OUT_SIZE)
    h_last = out_slab[T * BP:T * BP + B, :H]                           # (B, H)
    return y, h_last[None]                                             # state: (1, B, H)


# Single compiled executable: transposes/padding + pallas_call + un-packing fuse under jit.
seq2seq_decoder = jax.jit(_decoder_impl)


def reference_forward(x, state, p):
    """Pure-JAX reference mirroring the PyTorch Seq2SeqDecoder.forward semantics."""
    context = state[-1]                               # repeated over T
    h = state[-1]
    outs = []
    for t in range(T):
        xt = jnp.concatenate([x[:, t, :], context], axis=-1)        # (B, INPUT_SIZE + H)
        gi = xt @ p["w_ih"].T + p["b_ih"]
        gh = h @ p["w_hh"].T + p["b_hh"]
        r = jax.nn.sigmoid(gi[:, 0:H] + gh[:, 0:H])
        z = jax.nn.sigmoid(gi[:, H:2 * H] + gh[:, H:2 * H])
        n = jnp.tanh(gi[:, 2 * H:] + r * gh[:, 2 * H:])
        h = (1.0 - z) * n + z * h
        outs.append(h)
    out = jnp.stack(outs, axis=1)                     # (B, T, H)
    y = out @ p["w_d"].T + p["b_d"]                   # (B, T, OUT_SIZE)
    return y, h[None]


def make_params(key):
    ks = jax.random.split(key, 6)
    u = lambda k, shape, s: jax.random.uniform(k, shape, jnp.float32, -s, s)
    s_rnn = 1.0 / math.sqrt(H)
    return {
        # nn.GRU(input_size + num_hiddens, num_hiddens) parameters, PyTorch layout
        "w_ih": u(ks[0], (3 * H, INPUT_SIZE + H), s_rnn),
        "w_hh": u(ks[1], (3 * H, H), s_rnn),
        "b_ih": u(ks[2], (3 * H,), s_rnn),
        "b_hh": u(ks[3], (3 * H,), s_rnn),
        # nn.Linear(num_hiddens, output_size)
        "w_d": u(ks[4], (OUT_SIZE, H), s_rnn),
        "b_d": u(ks[5], (OUT_SIZE,), s_rnn),
    }


if __name__ == "__main__":
    key = jax.random.PRNGKey(0)
    pkey, xkey, skey = jax.random.split(key, 3)
    params = make_params(pkey)
    slab = _pack_params(params)            # packed ONCE at parameter-init time
    x = jax.random.normal(xkey, (B, T, INPUT_SIZE), jnp.float32)
    state = jax.random.normal(skey, (1, B, H), jnp.float32)   # encoder final hidden

    out, new_state = seq2seq_decoder(x, state, slab)
    out = jax.block_until_ready(out)
    new_state = jax.block_until_ready(new_state)

    ref_out, ref_state = reference_forward(x, state, params)
    assert out.shape == (B, T, OUT_SIZE), out.shape
    assert new_state.shape == (1, B, H), new_state.shape
    assert jnp.allclose(out, ref_out, atol=1e-3, rtol=1e-3), (out, ref_out)
    assert jnp.allclose(new_state, ref_state, atol=1e-3, rtol=1e-3), (new_state, ref_state)
    print("KERNEL_OK")
</pallas_src>

<mosaic_0001>
module attributes {stable_mosaic.version = 11 : i64} {
  func.func @_seq2seq_decoder_kernel(%arg0: memref<64x8xf32, #tpu.memory_space<vmem>>, %arg1: memref<8x8xf32, #tpu.memory_space<vmem>>, %arg2: memref<56x384xf32, #tpu.memory_space<vmem>>, %arg3: memref<72x128xf32, #tpu.memory_space<vmem>>) attributes {dimension_semantics = [], scalar_prefetch = 0 : i64, scratch_operands = 0 : i64, tpu.core_type = #tpu.core_type<tc>} {
    %c0 = arith.constant 0 : index
    %c0_0 = arith.constant 0 : index
    %0 = vector.load %arg0[%c0, %c0_0] : memref<64x8xf32, #tpu.memory_space<vmem>>, vector<64x8xf32>
    %c0_1 = arith.constant 0 : index
    %c0_2 = arith.constant 0 : index
    %1 = vector.load %arg1[%c0_1, %c0_2] : memref<8x8xf32, #tpu.memory_space<vmem>>, vector<8x8xf32>
    %c0_3 = arith.constant 0 : index
    %c0_4 = arith.constant 0 : index
    %2 = vector.load %arg2[%c0_3, %c0_4] : memref<56x384xf32, #tpu.memory_space<vmem>>, vector<8x384xf32>
    %c8 = arith.constant 8 : index
    %c0_5 = arith.constant 0 : index
    %3 = vector.load %arg2[%c8, %c0_5] : memref<56x384xf32, #tpu.memory_space<vmem>>, vector<8x384xf32>
    %c16 = arith.constant 16 : index
    %c0_6 = arith.constant 0 : index
    %4 = vector.load %arg2[%c16, %c0_6] : memref<56x384xf32, #tpu.memory_space<vmem>>, vector<8x384xf32>
    %c24 = arith.constant 24 : index
    %c0_7 = arith.constant 0 : index
    %5 = vector.load %arg2[%c24, %c0_7] : memref<56x384xf32, #tpu.memory_space<vmem>>, vector<1x384xf32>
    %c32 = arith.constant 32 : index
    %c0_8 = arith.constant 0 : index
    %6 = vector.load %arg2[%c32, %c0_8] : memref<56x384xf32, #tpu.memory_space<vmem>>, vector<1x8xf32>
    %c40 = arith.constant 40 : index
    %c0_9 = arith.constant 0 : index
    %7 = vector.load %arg2[%c40, %c0_9] : memref<56x384xf32, #tpu.memory_space<vmem>>, vector<8x128xf32>
    %c48 = arith.constant 48 : index
    %c0_10 = arith.constant 0 : index
    %8 = vector.load %arg2[%c48, %c0_10] : memref<56x384xf32, #tpu.memory_space<vmem>>, vector<1x128xf32>
    %cst = arith.constant dense<0.000000e+00> : vector<64x384xf32>
    %9 = tpu.matmul %0, %2, %cst {dimension_numbers = #tpu.dot_dimension_numbers<[1], [0], [0], [1], [0, 0, 1, 1], [], []>} : vector<64x8xf32>, vector<8x384xf32>, vector<64x384xf32> -> vector<64x384xf32>
    %cst_11 = arith.constant dense<0.000000e+00> : vector<8x384xf32>
    %10 = tpu.matmul %1, %3, %cst_11 {dimension_numbers = #tpu.dot_dimension_numbers<[1], [0], [0], [1], [0, 0, 1, 1], [], []>} : vector<8x8xf32>, vector<8x384xf32>, vector<8x384xf32> -> vector<8x384xf32>
    %11 = vector.broadcast %5 : vector<1x384xf32> to vector<8x384xf32>
    %12 = arith.addf %10, %11 : vector<8x384xf32>
    %13 = vector.extract_strided_slice %9 {offsets = [0, 0], sizes = [8, 384], strides = [1, 1]} : vector<64x384xf32> to vector<8x384xf32>
    %14 = arith.addf %13, %12 : vector<8x384xf32>
    %15 = vector.extract_strided_slice %9 {offsets = [8, 0], sizes = [8, 384], strides = [1, 1]} : vector<64x384xf32> to vector<8x384xf32>
    %16 = arith.addf %15, %12 : vector<8x384xf32>
    %17 = vector.extract_strided_slice %9 {offsets = [16, 0], sizes = [8, 384], strides = [1, 1]} : vector<64x384xf32> to vector<8x384xf32>
    %18 = arith.addf %17, %12 : vector<8x384xf32>
    %19 = vector.extract_strided_slice %9 {offsets = [24, 0], sizes = [8, 384], strides = [1, 1]} : vector<64x384xf32> to vector<8x384xf32>
    %20 = arith.addf %19, %12 : vector<8x384xf32>
    %21 = vector.extract_strided_slice %9 {offsets = [32, 0], sizes = [8, 384], strides = [1, 1]} : vector<64x384xf32> to vector<8x384xf32>
    %22 = arith.addf %21, %12 : vector<8x384xf32>
    %23 = vector.extract_strided_slice %9 {offsets = [40, 0], sizes = [8, 384], strides = [1, 1]} : vector<64x384xf32> to vector<8x384xf32>
    %24 = arith.addf %23, %12 : vector<8x384xf32>
    %25 = vector.extract_strided_slice %9 {offsets = [48, 0], sizes = [8, 384], strides = [1, 1]} : vector<64x384xf32> to vector<8x384xf32>
    %26 = arith.addf %25, %12 : vector<8x384xf32>
    %27 = vector.extract_strided_slice %9 {offsets = [56, 0], sizes = [8, 384], strides = [1, 1]} : vector<64x384xf32> to vector<8x384xf32>
    %28 = arith.addf %27, %12 : vector<8x384xf32>
    %cst_12 = arith.constant dense<0.000000e+00> : vector<8x384xf32>
    %29 = tpu.matmul %1, %4, %cst_12 {dimension_numbers = #tpu.dot_dimension_numbers<[1], [0], [0], [1], [0, 0, 1, 1], [], []>} : vector<8x8xf32>, vector<8x384xf32>, vector<8x384xf32> -> vector<8x384xf32>
    %30 = vector.extract_strided_slice %14 {offsets = [0, 0], sizes = [8, 8], strides = [1, 1]} : vector<8x384xf32> to vector<8x8xf32>
    %31 = vector.extract_strided_slice %29 {offsets = [0, 0], sizes = [8, 8], strides = [1, 1]} : vector<8x384xf32> to vector<8x8xf32>
    %32 = arith.addf %30, %31 : vector<8x8xf32>
    %33 = arith.negf %32 : vector<8x8xf32>
    %34 = math.exp %33 : vector<8x8xf32>
    %cst_13 = arith.constant 1.000000e+00 : f32
    %35 = vector.broadcast %cst_13 : f32 to vector<8x8xf32>
    %36 = arith.addf %35, %34 : vector<8x8xf32>
    %37 = arith.divf %35, %36 : vector<8x8xf32>
    %38 = vector.extract_strided_slice %14 {offsets = [0, 128], sizes = [8, 8], strides = [1, 1]} : vector<8x384xf32> to vector<8x8xf32>
    %39 = vector.extract_strided_slice %29 {offsets = [0, 128], sizes = [8, 8], strides = [1, 1]} : vector<8x384xf32> to vector<8x8xf32>
    %40 = arith.addf %38, %39 : vector<8x8xf32>
    %41 = arith.negf %40 : vector<8x8xf32>
    %42 = math.exp %41 : vector<8x8xf32>
    %cst_14 = arith.constant 1.000000e+00 : f32
    %43 = vector.broadcast %cst_14 : f32 to vector<8x8xf32>
    %44 = arith.addf %43, %42 : vector<8x8xf32>
    %45 = arith.divf %43, %44 : vector<8x8xf32>
    %46 = vector.extract_strided_slice %14 {offsets = [0, 256], sizes = [8, 8], strides = [1, 1]} : vector<8x384xf32> to vector<8x8xf32>
    %47 = vector.extract_strided_slice %29 {offsets = [0, 256], sizes = [8, 8], strides = [1, 1]} : vector<8x384xf32> to vector<8x8xf32>
    %48 = vector.broadcast %6 : vector<1x8xf32> to vector<8x8xf32>
    %49 = arith.addf %47, %48 : vector<8x8xf32>
    %50 = arith.mulf %37, %49 : vector<8x8xf32>
    %51 = arith.addf %46, %50 : vector<8x8xf32>
    %52 = math.tanh %51 : vector<8x8xf32>
    %cst_15 = arith.constant 1.000000e+00 : f32
    %53 = vector.broadcast %cst_15 : f32 to vector<8x8xf32>
    %54 = arith.subf %53, %45 : vector<8x8xf32>
    %55 = arith.mulf %54, %52 : vector<8x8xf32>
    %56 = arith.mulf %45, %1 : vector<8x8xf32>
    %57 = arith.addf %55, %56 : vector<8x8xf32>
    %cst_16 = arith.constant dense<0.000000e+00> : vector<8x384xf32>
    %58 = tpu.matmul %57, %4, %cst_16 {dimension_numbers = #tpu.dot_dimension_numbers<[1], [0], [0], [1], [0, 0, 1, 1], [], []>} : vector<8x8xf32>, vector<8x384xf32>, vector<8x384xf32> -> vector<8x384xf32>
    %59 = vector.extract_strided_slice %16 {offsets = [0, 0], sizes = [8, 8], strides = [1, 1]} : vector<8x384xf32> to vector<8x8xf32>
    %60 = vector.extract_strided_slice %58 {offsets = [0, 0], sizes = [8, 8], strides = [1, 1]} : vector<8x384xf32> to vector<8x8xf32>
    %61 = arith.addf %59, %60 : vector<8x8xf32>
    %62 = arith.negf %61 : vector<8x8xf32>
    %63 = math.exp %62 : vector<8x8xf32>
    %cst_17 = arith.constant 1.000000e+00 : f32
    %64 = vector.broadcast %cst_17 : f32 to vector<8x8xf32>
    %65 = arith.addf %64, %63 : vector<8x8xf32>
    %66 = arith.divf %64, %65 : vector<8x8xf32>
    %67 = vector.extract_strided_slice %16 {offsets = [0, 128], sizes = [8, 8], strides = [1, 1]} : vector<8x384xf32> to vector<8x8xf32>
    %68 = vector.extract_strided_slice %58 {offsets = [0, 128], sizes = [8, 8], strides = [1, 1]} : vector<8x384xf32> to vector<8x8xf32>
    %69 = arith.addf %67, %68 : vector<8x8xf32>
    %70 = arith.negf %69 : vector<8x8xf32>
    %71 = math.exp %70 : vector<8x8xf32>
    %cst_18 = arith.constant 1.000000e+00 : f32
    %72 = vector.broadcast %cst_18 : f32 to vector<8x8xf32>
    %73 = arith.addf %72, %71 : vector<8x8xf32>
    %74 = arith.divf %72, %73 : vector<8x8xf32>
    %75 = vector.extract_strided_slice %16 {offsets = [0, 256], sizes = [8, 8], strides = [1, 1]} : vector<8x384xf32> to vector<8x8xf32>
    %76 = vector.extract_strided_slice %58 {offsets = [0, 256], sizes = [8, 8], strides = [1, 1]} : vector<8x384xf32> to vector<8x8xf32>
    %77 = vector.broadcast %6 : vector<1x8xf32> to vector<8x8xf32>
    %78 = arith.addf %76, %77 : vector<8x8xf32>
    %79 = arith.mulf %66, %78 : vector<8x8xf32>
    %80 = arith.addf %75, %79 : vector<8x8xf32>
    %81 = math.tanh %80 : vector<8x8xf32>
    %cst_19 = arith.constant 1.000000e+00 : f32
    %82 = vector.broadcast %cst_19 : f32 to vector<8x8xf32>
    %83 = arith.subf %82, %74 : vector<8x8xf32>
    %84 = arith.mulf %83, %81 : vector<8x8xf32>
    %85 = arith.mulf %74, %57 : vector<8x8xf32>
    %86 = arith.addf %84, %85 : vector<8x8xf32>
    %cst_20 = arith.constant dense<0.000000e+00> : vector<8x384xf32>
    %87 = tpu.matmul %86, %4, %cst_20 {dimension_numbers = #tpu.dot_dimension_numbers<[1], [0], [0], [1], [0, 0, 1, 1], [], []>} : vector<8x8xf32>, vector<8x384xf32>, vector<8x384xf32> -> vector<8x384xf32>
    %88 = vector.extract_strided_slice %18 {offsets = [0, 0], sizes = [8, 8], strides = [1, 1]} : vector<8x384xf32> to vector<8x8xf32>
    %89 = vector.extract_strided_slice %87 {offsets = [0, 0], sizes = [8, 8], strides = [1, 1]} : vector<8x384xf32> to vector<8x8xf32>
    %90 = arith.addf %88, %89 : vector<8x8xf32>
    %91 = arith.negf %90 : vector<8x8xf32>
    %92 = math.exp %91 : vector<8x8xf32>
    %cst_21 = arith.constant 1.000000e+00 : f32
    %93 = vector.broadcast %cst_21 : f32 to vector<8x8xf32>
    %94 = arith.addf %93, %92 : vector<8x8xf32>
    %95 = arith.divf %93, %94 : vector<8x8xf32>
    %96 = vector.extract_strided_slice %18 {offsets = [0, 128], sizes = [8, 8], strides = [1, 1]} : vector<8x384xf32> to vector<8x8xf32>
    %97 = vector.extract_strided_slice %87 {offsets = [0, 128], sizes = [8, 8], strides = [1, 1]} : vector<8x384xf32> to vector<8x8xf32>
    %98 = arith.addf %96, %97 : vector<8x8xf32>
    %99 = arith.negf %98 : vector<8x8xf32>
    %100 = math.exp %99 : vector<8x8xf32>
    %cst_22 = arith.constant 1.000000e+00 : f32
    %101 = vector.broadcast %cst_22 : f32 to vector<8x8xf32>
    %102 = arith.addf %101, %100 : vector<8x8xf32>
    %103 = arith.divf %101, %102 : vector<8x8xf32>
    %104 = vector.extract_strided_slice %18 {offsets = [0, 256], sizes = [8, 8], strides = [1, 1]} : vector<8x384xf32> to vector<8x8xf32>
    %105 = vector.extract_strided_slice %87 {offsets = [0, 256], sizes = [8, 8], strides = [1, 1]} : vector<8x384xf32> to vector<8x8xf32>
    %106 = vector.broadcast %6 : vector<1x8xf32> to vector<8x8xf32>
    %107 = arith.addf %105, %106 : vector<8x8xf32>
    %108 = arith.mulf %95, %107 : vector<8x8xf32>
    %109 = arith.addf %104, %108 : vector<8x8xf32>
    %110 = math.tanh %109 : vector<8x8xf32>
    %cst_23 = arith.constant 1.000000e+00 : f32
    %111 = vector.broadcast %cst_23 : f32 to vector<8x8xf32>
    %112 = arith.subf %111, %103 : vector<8x8xf32>
    %113 = arith.mulf %112, %110 : vector<8x8xf32>
    %114 = arith.mulf %103, %86 : vector<8x8xf32>
    %115 = arith.addf %113, %114 : vector<8x8xf32>
    %cst_24 = arith.constant dense<0.000000e+00> : vector<8x384xf32>
    %116 = tpu.matmul %115, %4, %cst_24 {dimension_numbers = #tpu.dot_dimension_numbers<[1], [0], [0], [1], [0, 0, 1, 1], [], []>} : vector<8x8xf32>, vector<8x384xf32>, vector<8x384xf32> -> vector<8x384xf32>
    %117 = vector.extract_strided_slice %20 {offsets = [0, 0], sizes = [8, 8], strides = [1, 1]} : vector<8x384xf32> to vector<8x8xf32>
    %118 = vector.extract_strided_slice %116 {offsets = [0, 0], sizes = [8, 8], strides = [1, 1]} : vector<8x384xf32> to vector<8x8xf32>
    %119 = arith.addf %117, %118 : vector<8x8xf32>
    %120 = arith.negf %119 : vector<8x8xf32>
    %121 = math.exp %120 : vector<8x8xf32>
    %cst_25 = arith.constant 1.000000e+00 : f32
    %122 = vector.broadcast %cst_25 : f32 to vector<8x8xf32>
    %123 = arith.addf %122, %121 : vector<8x8xf32>
    %124 = arith.divf %122, %123 : vector<8x8xf32>
    %125 = vector.extract_strided_slice %20 {offsets = [0, 128], sizes = [8, 8], strides = [1, 1]} : vector<8x384xf32> to vector<8x8xf32>
    %126 = vector.extract_strided_slice %116 {offsets = [0, 128], sizes = [8, 8], strides = [1, 1]} : vector<8x384xf32> to vector<8x8xf32>
    %127 = arith.addf %125, %126 : vector<8x8xf32>
    %128 = arith.negf %127 : vector<8x8xf32>
    %129 = math.exp %128 : vector<8x8xf32>
    %cst_26 = arith.constant 1.000000e+00 : f32
    %130 = vector.broadcast %cst_26 : f32 to vector<8x8xf32>
    %131 = arith.addf %130, %129 : vector<8x8xf32>
    %132 = arith.divf %130, %131 : vector<8x8xf32>
    %133 = vector.extract_strided_slice %20 {offsets = [0, 256], sizes = [8, 8], strides = [1, 1]} : vector<8x384xf32> to vector<8x8xf32>
    %134 = vector.extract_strided_slice %116 {offsets = [0, 256], sizes = [8, 8], strides = [1, 1]} : vector<8x384xf32> to vector<8x8xf32>
    %135 = vector.broadcast %6 : vector<1x8xf32> to vector<8x8xf32>
    %136 = arith.addf %134, %135 : vector<8x8xf32>
    %137 = arith.mulf %124, %136 : vector<8x8xf32>
    %138 = arith.addf %133, %137 : vector<8x8xf32>
    %139 = math.tanh %138 : vector<8x8xf32>
    %cst_27 = arith.constant 1.000000e+00 : f32
    %140 = vector.broadcast %cst_27 : f32 to vector<8x8xf32>
    %141 = arith.subf %140, %132 : vector<8x8xf32>
    %142 = arith.mulf %141, %139 : vector<8x8xf32>
    %143 = arith.mulf %132, %115 : vector<8x8xf32>
    %144 = arith.addf %142, %143 : vector<8x8xf32>
    %cst_28 = arith.constant dense<0.000000e+00> : vector<8x384xf32>
    %145 = tpu.matmul %144, %4, %cst_28 {dimension_numbers = #tpu.dot_dimension_numbers<[1], [0], [0], [1], [0, 0, 1, 1], [], []>} : vector<8x8xf32>, vector<8x384xf32>, vector<8x384xf32> -> vector<8x384xf32>
    %146 = vector.extract_strided_slice %22 {offsets = [0, 0], sizes = [8, 8], strides = [1, 1]} : vector<8x384xf32> to vector<8x8xf32>
    %147 = vector.extract_strided_slice %145 {offsets = [0, 0], sizes = [8, 8], strides = [1, 1]} : vector<8x384xf32> to vector<8x8xf32>
    %148 = arith.addf %146, %147 : vector<8x8xf32>
    %149 = arith.negf %148 : vector<8x8xf32>
    %150 = math.exp %149 : vector<8x8xf32>
    %cst_29 = arith.constant 1.000000e+00 : f32
    %151 = vector.broadcast %cst_29 : f32 to vector<8x8xf32>
    %152 = arith.addf %151, %150 : vector<8x8xf32>
    %153 = arith.divf %151, %152 : vector<8x8xf32>
    %154 = vector.extract_strided_slice %22 {offsets = [0, 128], sizes = [8, 8], strides = [1, 1]} : vector<8x384xf32> to vector<8x8xf32>
    %155 = vector.extract_strided_slice %145 {offsets = [0, 128], sizes = [8, 8], strides = [1, 1]} : vector<8x384xf32> to vector<8x8xf32>
    %156 = arith.addf %154, %155 : vector<8x8xf32>
    %157 = arith.negf %156 : vector<8x8xf32>
    %158 = math.exp %157 : vector<8x8xf32>
    %cst_30 = arith.constant 1.000000e+00 : f32
    %159 = vector.broadcast %cst_30 : f32 to vector<8x8xf32>
    %160 = arith.addf %159, %158 : vector<8x8xf32>
    %161 = arith.divf %159, %160 : vector<8x8xf32>
    %162 = vector.extract_strided_slice %22 {offsets = [0, 256], sizes = [8, 8], strides = [1, 1]} : vector<8x384xf32> to vector<8x8xf32>
    %163 = vector.extract_strided_slice %145 {offsets = [0, 256], sizes = [8, 8], strides = [1, 1]} : vector<8x384xf32> to vector<8x8xf32>
    %164 = vector.broadcast %6 : vector<1x8xf32> to vector<8x8xf32>
    %165 = arith.addf %163, %164 : vector<8x8xf32>
    %166 = arith.mulf %153, %165 : vector<8x8xf32>
    %167 = arith.addf %162, %166 : vector<8x8xf32>
    %168 = math.tanh %167 : vector<8x8xf32>
    %cst_31 = arith.constant 1.000000e+00 : f32
    %169 = vector.broadcast %cst_31 : f32 to vector<8x8xf32>
    %170 = arith.subf %169, %161 : vector<8x8xf32>
    %171 = arith.mulf %170, %168 : vector<8x8xf32>
    %172 = arith.mulf %161, %144 : vector<8x8xf32>
    %173 = arith.addf %171, %172 : vector<8x8xf32>
    %cst_32 = arith.constant dense<0.000000e+00> : vector<8x384xf32>
    %174 = tpu.matmul %173, %4, %cst_32 {dimension_numbers = #tpu.dot_dimension_numbers<[1], [0], [0], [1], [0, 0, 1, 1], [], []>} : vector<8x8xf32>, vector<8x384xf32>, vector<8x384xf32> -> vector<8x384xf32>
    %175 = vector.extract_strided_slice %24 {offsets = [0, 0], sizes = [8, 8], strides = [1, 1]} : vector<8x384xf32> to vector<8x8xf32>
    %176 = vector.extract_strided_slice %174 {offsets = [0, 0], sizes = [8, 8], strides = [1, 1]} : vector<8x384xf32> to vector<8x8xf32>
    %177 = arith.addf %175, %176 : vector<8x8xf32>
    %178 = arith.negf %177 : vector<8x8xf32>
    %179 = math.exp %178 : vector<8x8xf32>
    %cst_33 = arith.constant 1.000000e+00 : f32
    %180 = vector.broadcast %cst_33 : f32 to vector<8x8xf32>
    %181 = arith.addf %180, %179 : vector<8x8xf32>
    %182 = arith.divf %180, %181 : vector<8x8xf32>
    %183 = vector.extract_strided_slice %24 {offsets = [0, 128], sizes = [8, 8], strides = [1, 1]} : vector<8x384xf32> to vector<8x8xf32>
    %184 = vector.extract_strided_slice %174 {offsets = [0, 128], sizes = [8, 8], strides = [1, 1]} : vector<8x384xf32> to vector<8x8xf32>
    %185 = arith.addf %183, %184 : vector<8x8xf32>
    %186 = arith.negf %185 : vector<8x8xf32>
    %187 = math.exp %186 : vector<8x8xf32>
    %cst_34 = arith.constant 1.000000e+00 : f32
    %188 = vector.broadcast %cst_34 : f32 to vector<8x8xf32>
    %189 = arith.addf %188, %187 : vector<8x8xf32>
    %190 = arith.divf %188, %189 : vector<8x8xf32>
    %191 = vector.extract_strided_slice %24 {offsets = [0, 256], sizes = [8, 8], strides = [1, 1]} : vector<8x384xf32> to vector<8x8xf32>
    %192 = vector.extract_strided_slice %174 {offsets = [0, 256], sizes = [8, 8], strides = [1, 1]} : vector<8x384xf32> to vector<8x8xf32>
    %193 = vector.broadcast %6 : vector<1x8xf32> to vector<8x8xf32>
    %194 = arith.addf %192, %193 : vector<8x8xf32>
    %195 = arith.mulf %182, %194 : vector<8x8xf32>
    %196 = arith.addf %191, %195 : vector<8x8xf32>
    %197 = math.tanh %196 : vector<8x8xf32>
    %cst_35 = arith.constant 1.000000e+00 : f32
    %198 = vector.broadcast %cst_35 : f32 to vector<8x8xf32>
    %199 = arith.subf %198, %190 : vector<8x8xf32>
    %200 = arith.mulf %199, %197 : vector<8x8xf32>
    %201 = arith.mulf %190, %173 : vector<8x8xf32>
    %202 = arith.addf %200, %201 : vector<8x8xf32>
    %cst_36 = arith.constant dense<0.000000e+00> : vector<8x384xf32>
    %203 = tpu.matmul %202, %4, %cst_36 {dimension_numbers = #tpu.dot_dimension_numbers<[1], [0], [0], [1], [0, 0, 1, 1], [], []>} : vector<8x8xf32>, vector<8x384xf32>, vector<8x384xf32> -> vector<8x384xf32>
    %204 = vector.extract_strided_slice %26 {offsets = [0, 0], sizes = [8, 8], strides = [1, 1]} : vector<8x384xf32> to vector<8x8xf32>
    %205 = vector.extract_strided_slice %203 {offsets = [0, 0], sizes = [8, 8], strides = [1, 1]} : vector<8x384xf32> to vector<8x8xf32>
    %206 = arith.addf %204, %205 : vector<8x8xf32>
    %207 = arith.negf %206 : vector<8x8xf32>
    %208 = math.exp %207 : vector<8x8xf32>
    %cst_37 = arith.constant 1.000000e+00 : f32
    %209 = vector.broadcast %cst_37 : f32 to vector<8x8xf32>
    %210 = arith.addf %209, %208 : vector<8x8xf32>
    %211 = arith.divf %209, %210 : vector<8x8xf32>
    %212 = vector.extract_strided_slice %26 {offsets = [0, 128], sizes = [8, 8], strides = [1, 1]} : vector<8x384xf32> to vector<8x8xf32>
    %213 = vector.extract_strided_slice %203 {offsets = [0, 128], sizes = [8, 8], strides = [1, 1]} : vector<8x384xf32> to vector<8x8xf32>
    %214 = arith.addf %212, %213 : vector<8x8xf32>
    %215 = arith.negf %214 : vector<8x8xf32>
    %216 = math.exp %215 : vector<8x8xf32>
    %cst_38 = arith.constant 1.000000e+00 : f32
    %217 = vector.broadcast %cst_38 : f32 to vector<8x8xf32>
    %218 = arith.addf %217, %216 : vector<8x8xf32>
    %219 = arith.divf %217, %218 : vector<8x8xf32>
    %220 = vector.extract_strided_slice %26 {offsets = [0, 256], sizes = [8, 8], strides = [1, 1]} : vector<8x384xf32> to vector<8x8xf32>
    %221 = vector.extract_strided_slice %203 {offsets = [0, 256], sizes = [8, 8], strides = [1, 1]} : vector<8x384xf32> to vector<8x8xf32>
    %222 = vector.broadcast %6 : vector<1x8xf32> to vector<8x8xf32>
    %223 = arith.addf %221, %222 : vector<8x8xf32>
    %224 = arith.mulf %211, %223 : vector<8x8xf32>
    %225 = arith.addf %220, %224 : vector<8x8xf32>
    %226 = math.tanh %225 : vector<8x8xf32>
    %cst_39 = arith.constant 1.000000e+00 : f32
    %227 = vector.broadcast %cst_39 : f32 to vector<8x8xf32>
    %228 = arith.subf %227, %219 : vector<8x8xf32>
    %229 = arith.mulf %228, %226 : vector<8x8xf32>
    %230 = arith.mulf %219, %202 : vector<8x8xf32>
    %231 = arith.addf %229, %230 : vector<8x8xf32>
    %cst_40 = arith.constant dense<0.000000e+00> : vector<8x384xf32>
    %232 = tpu.matmul %231, %4, %cst_40 {dimension_numbers = #tpu.dot_dimension_numbers<[1], [0], [0], [1], [0, 0, 1, 1], [], []>} : vector<8x8xf32>, vector<8x384xf32>, vector<8x384xf32> -> vector<8x384xf32>
    %233 = vector.extract_strided_slice %28 {offsets = [0, 0], sizes = [8, 8], strides = [1, 1]} : vector<8x384xf32> to vector<8x8xf32>
    %234 = vector.extract_strided_slice %232 {offsets = [0, 0], sizes = [8, 8], strides = [1, 1]} : vector<8x384xf32> to vector<8x8xf32>
    %235 = arith.addf %233, %234 : vector<8x8xf32>
    %236 = arith.negf %235 : vector<8x8xf32>
    %237 = math.exp %236 : vector<8x8xf32>
    %cst_41 = arith.constant 1.000000e+00 : f32
    %238 = vector.broadcast %cst_41 : f32 to vector<8x8xf32>
    %239 = arith.addf %238, %237 : vector<8x8xf32>
    %240 = arith.divf %238, %239 : vector<8x8xf32>
    %241 = vector.extract_strided_slice %28 {offsets = [0, 128], sizes = [8, 8], strides = [1, 1]} : vector<8x384xf32> to vector<8x8xf32>
    %242 = vector.extract_strided_slice %232 {offsets = [0, 128], sizes = [8, 8], strides = [1, 1]} : vector<8x384xf32> to vector<8x8xf32>
    %243 = arith.addf %241, %242 : vector<8x8xf32>
    %244 = arith.negf %243 : vector<8x8xf32>
    %245 = math.exp %244 : vector<8x8xf32>
    %cst_42 = arith.constant 1.000000e+00 : f32
    %246 = vector.broadcast %cst_42 : f32 to vector<8x8xf32>
    %247 = arith.addf %246, %245 : vector<8x8xf32>
    %248 = arith.divf %246, %247 : vector<8x8xf32>
    %249 = vector.extract_strided_slice %28 {offsets = [0, 256], sizes = [8, 8], strides = [1, 1]} : vector<8x384xf32> to vector<8x8xf32>
    %250 = vector.extract_strided_slice %232 {offsets = [0, 256], sizes = [8, 8], strides = [1, 1]} : vector<8x384xf32> to vector<8x8xf32>
    %251 = vector.broadcast %6 : vector<1x8xf32> to vector<8x8xf32>
    %252 = arith.addf %250, %251 : vector<8x8xf32>
    %253 = arith.mulf %240, %252 : vector<8x8xf32>
    %254 = arith.addf %249, %253 : vector<8x8xf32>
    %255 = math.tanh %254 : vector<8x8xf32>
    %cst_43 = arith.constant 1.000000e+00 : f32
    %256 = vector.broadcast %cst_43 : f32 to vector<8x8xf32>
    %257 = arith.subf %256, %248 : vector<8x8xf32>
    %258 = arith.mulf %257, %255 : vector<8x8xf32>
    %259 = arith.mulf %248, %231 : vector<8x8xf32>
    %260 = arith.addf %258, %259 : vector<8x8xf32>
    %261 = tpu.concatenate %57, %86, %115, %144, %173, %202, %231, %260 in 0 : vector<8x8xf32>, vector<8x8xf32>, vector<8x8xf32>, vector<8x8xf32>, vector<8x8xf32>, vector<8x8xf32>, vector<8x8xf32>, vector<8x8xf32> -> vector<64x8xf32>
    %cst_44 = arith.constant dense<0.000000e+00> : vector<64x128xf32>
    %262 = tpu.matmul %261, %7, %cst_44 {dimension_numbers = #tpu.dot_dimension_numbers<[1], [0], [0], [1], [0, 0, 1, 1], [], []>} : vector<64x8xf32>, vector<8x128xf32>, vector<64x128xf32> -> vector<64x128xf32>
    %263 = vector.broadcast %8 : vector<1x128xf32> to vector<64x128xf32>
    %264 = arith.addf %262, %263 : vector<64x128xf32>
    %c0_45 = arith.constant 0 : index
    %c0_46 = arith.constant 0 : index
    %265 = vector.load %arg3[%c0_45, %c0_46] : memref<72x128xf32, #tpu.memory_space<vmem>>, vector<64x128xf32>
    tpu.vector_store %arg3[%c0_45, %c0_46], %264 {strides = array<i32>} : memref<72x128xf32, #tpu.memory_space<vmem>>, vector<64x128xf32>,
    %c64 = arith.constant 64 : index
    %c0_47 = arith.constant 0 : index
    %266 = vector.load %arg3[%c64, %c0_47] : memref<72x128xf32, #tpu.memory_space<vmem>>, vector<8x8xf32>
    tpu.vector_store %arg3[%c64, %c0_47], %260 {strides = array<i32>} : memref<72x128xf32, #tpu.memory_space<vmem>>, vector<8x8xf32>,
    return
  }
}

</mosaic_0001>

<bundles_post_ra>
// kernel: _decoder_impl.1
= control target key start
LH: loop header
LB: loop body
LE: loop exit
PB: predicated region body
PF: predicated region fallthrough
CT: control target
= control target key end

     0   :  { %8 = vsyncpa [#allocation3], 0  ;;  %s1425_s15 = smov [#allocation2]   ;;  %s1426_s17 = smov 384   ;;  %s1759_s0 = inlined_call_operand.vmem [shape: f32[64,8], index: 0, kind: input, shape index: {}]   ;;  %s1760_s1 = inlined_call_operand.vmem [shape: f32[8,8], index: 1, kind: input, shape index: {}]   ;;  %s1761_s2 = inlined_call_operand.hbm [shape: f32[56,384], index: 2, kind: input, shape index: {}]   ;;  %s1762_s3 = inlined_call_operand.vmem [shape: f32[72,128], index: 3, kind: output, shape index: {}]  }
   0x1   :  { %s17_s14 = sshll.u32 %s1761_s2, 4  ;;  %s19_s16 = sshll.u32 %s1425_s15, 4  ;;  %s18_s14 = int_to_ptr.hbm [resolvable:$true] %s17_s14  ;;  %s20_s16 = int_to_ptr.vmem [resolvable:$true] %s19_s16 }
   0x2   :  { %s1427_s18 = smov 24  }
   0x3   :  { %25 = dma.hbm_to_vmem [thread:$0]  %s18_s14, 2688, %s20_s16, [#allocation3], %s1426_s17, %s1426_s17, %s1427_s18  }
   0x4   :  { %1423 = dma.done.wait [#allocation3], 2688  }
   0x5   :  { %1424 = vsyncadd [#allocation3], 4294964608  ;;  %v39_v0 = vld [vmem:[#allocation2] sm:$0xff]  ;;  %v42_v1 = vld [vmem:[#allocation2 + $0x18] sm:$0xff]  ;;  %vm53_vm0 = vcmask 64512  }
   0x6   :  { %v30_v2 = vld [vmem:[%s1759_s0] sm:$0xff]  ;;  %93 = vmatpush.msra.mxu0 %v39_v0  ;;  %1313 = vmatpush.msra.mxu1 %v39_v0  ;;  %v35_v3 = vld [vmem:[%s1759_s0 + $0x28] sm:$0xff]  ;;  %v36_v4 = vld [vmem:[%s1759_s0 + $0x30] sm:$0xff] }
   0x7   :  { %v1463_v5 = vld [vmem:[%s1760_s1] sm:$0xff]  ;;  %1314 = vmatpush.msra.mxu2 %v39_v0  ;;  %226 = vmatpush.msra.mxu3 %v42_v1  ;;  %v40_v7 = vld [vmem:[#allocation2 + $0x8] sm:$0xff]  ;;  %v41_v9 = vld [vmem:[#allocation2 + $0x10] sm:$0xff] }
   0x8   :  { %v43_v6 = vld [vmem:[#allocation2 + $0x20] sm:$0xff]  ;;  %1238 = vmatmul.msk.f32.vlgmr.msra.gmra.mxu0 %vm53_vm0, %v30_v2  ;;  %1243 = vmatmul.msk.f32.vlgmr.msra.gmra.mxu1 %vm53_vm0, %v35_v3  ;;  %v44_v8 = vld [vmem:[#allocation2 + $0x28] sm:$0xff]  ;;  %v1470_v10 = vld [vmem:[#allocation2 + $0x30] sm:$0xff] }
   0x9   :  { %1244 = vmatmul.msk.f32.vlgmr.msra.gmra.mxu2 %vm53_vm0, %v36_v4  ;;  %1262 = vmatmul.msk.f32.vlgmr.msra.gmra.mxu3 %vm53_vm0, %v1463_v5  ;;  %v1472_v11 = vld [vmem:[#allocation2 + $0x38] sm:$0xff]  ;;  %v31_v12 = vld [vmem:[%s1759_s0 + $0x8] sm:$0xff]  ;;  %v1487_v14 = vld [vmem:[#allocation2 + $0x40] sm:$0xff] }
   0xa   :  { %246 = vmatpush.msrb.mxu3 %v43_v6  ;;  %134 = vmatpush.msrb.mxu1 %v40_v7  ;;  %v37_v13 = vld [vmem:[%s1759_s0 + $0x38] sm:$0xff]  ;;  %v32_v15 = vld [vmem:[%s1759_s0 + $0x10] sm:$0xff]  ;;  %v34_v17 = vld [vmem:[%s1759_s0 + $0x20] sm:$0xff] }
   0xb   :  { %175 = vmatpush.msrb.mxu2 %v41_v9  ;;  %461 = vmatpush.msrb.mxu0 %v1487_v14  ;;  %v33_v16 = vld [vmem:[%s1759_s0 + $0x18] sm:$0xff] }
   0xc   :  { %266 = vmatpush.msra.mxu3 %v44_v8  ;;  %532 = vmatpush.msra.mxu1 %v1470_v10  ;;  %v49_v20 = vld [vmem:[#allocation2 + $0x48] ss:$8 sm:$0x7]  ;;  %v1579_v8 = vld [vmem:[#allocation2 + $0x60] ss:$0 sm:$0xff] }
   0xd   :  { %552 = vmatpush.msra.mxu2 %v1472_v11  ;;  %643 = vmatpush.msra.mxu0 %v1470_v10  ;;  %v202_v21 = vperm.slane %v49_v20, 0  ;;  %v203_v40 = vperm.slane %v49_v20, 1  ;;  %v204_v48 = vperm.slane %v49_v20, 2 }
  0x10   :  { %1239 = vmatmul.msk.f32.gmra.mxu0 %vm53_vm0, %v31_v12  ;;  %1246 = vmatmul.msk.f32.vlgmr.msrb.gmra.mxu1 %vm53_vm0, %v30_v2 }
  0x11   :  { %1245 = vmatmul.msk.f32.gmra.mxu2 %vm53_vm0, %v37_v13  ;;  %1263 = vmatmul.msk.f32.vlgmr.msrb.gmra.mxu3 %vm53_vm0, %v1463_v5 }
  0x12   :  { %310 = vmatpush.msrb.mxu3 %v1470_v10  ;;  %663 = vmatpush.msrb.mxu1 %v1472_v11 }
  0x18   :  { %1240 = vmatmul.msk.f32.gmra.mxu0 %vm53_vm0, %v32_v15  ;;  %1247 = vmatmul.msk.f32.gmra.mxu1 %vm53_vm0, %v31_v12 }
  0x19   :  { %1254 = vmatmul.msk.f32.vlgmr.msrb.gmra.mxu2 %vm53_vm0, %v30_v2  ;;  %1264 = vmatmul.msk.f32.vlgmr.msra.gmra.mxu3 %vm53_vm0, %v1463_v5 }
  0x1a   :  { %330 = vmatpush.msra.mxu3 %v1472_v11  ;;  %683 = vmatpush.msrb.mxu2 %v1487_v14 }
  0x20   :  { %1241 = vmatmul.msk.f32.gmra.mxu0 %vm53_vm0, %v33_v16  ;;  %1248 = vmatmul.msk.f32.gmra.mxu1 %vm53_vm0, %v32_v15 }
  0x21   :  { %1255 = vmatmul.msk.f32.gmra.mxu2 %vm53_vm0, %v31_v12  ;;  %1265 = vmatmul.msk.f32.vlgmr.msrb.gmra.mxu3 %vm53_vm0, %v1463_v5 }
  0x22   :  { %350 = vmatpush.msrb.mxu3 %v1487_v14 }
  0x28   :  { %1242 = vmatmul.msk.f32.gmra.mxu0 %vm53_vm0, %v34_v17  ;;  %1249 = vmatmul.msk.f32.gmra.mxu1 %vm53_vm0, %v33_v16 }
  0x29   :  { %1256 = vmatmul.msk.f32.gmra.mxu2 %vm53_vm0, %v32_v15  ;;  %1266 = vmatmul.msk.f32.vlgmr.msra.gmra.mxu3 %vm53_vm0, %v1463_v5 }
  0x2a   :  { %421 = vmatpush.msra.mxu3 %v1470_v10 }
  0x30   :  { %1250 = vmatmul.msk.f32.gmra.mxu1 %vm53_vm0, %v34_v17 }
  0x31   :  { %1257 = vmatmul.msk.f32.gmra.mxu2 %vm53_vm0, %v33_v16  ;;  %1267 = vmatmul.msk.f32.vlgmr.msrb.gmra.mxu3 %vm53_vm0, %v1463_v5 }
  0x32   :  { %441 = vmatpush.msrb.mxu3 %v1472_v11 }
  0x38   :  { %1251 = vmatmul.msk.f32.gmra.mxu1 %vm53_vm0, %v35_v3 }
  0x39   :  { %1258 = vmatmul.msk.f32.gmra.mxu2 %vm53_vm0, %v34_v17 }
  0x40   :  { %1252 = vmatmul.msk.f32.gmra.mxu1 %vm53_vm0, %v36_v4 }
  0x41   :  { %1259 = vmatmul.msk.f32.gmra.mxu2 %vm53_vm0, %v35_v3 }
  0x48   :  { %1253 = vmatmul.msk.f32.gmra.mxu1 %vm53_vm0, %v37_v13 }
  0x49   :  { %1260 = vmatmul.msk.f32.gmra.mxu2 %vm53_vm0, %v36_v4 }
  0x51   :  { %1261 = vmatmul.msk.f32.gmra.mxu2 %vm53_vm0, %v37_v13 }
  0x85   :  { %v95_v18 = vpop.f32.mrf.mxu0  ;;  %v110_v19 = vpop.f32.mrf.mxu1 }
  0x8c   :  { %v113_v22 = vpop.f32.mrf.mxu2  ;;  %v228_v23 = vpop.f32.mrf.mxu3 }
  0x8d   :  { %v1533_v24 = vadd.f32 %v228_v23, %v202_v21  ;;  %v1535_v25 = vpop.f32.mrf.mxu0  ;;  %v136_v26 = vpop.f32.mrf.mxu1 }
  0x8f   :  { %v1538_v27 = vadd.f32 %v1533_v24, %v110_v19  ;;  %v1541_v28 = vadd.f32 %v1533_v24, %v113_v22  ;;  %v271_v41 = vadd.f32 %v1533_v24, %v95_v18 }
  0x94   :  { %v116_v29 = vpop.f32.mrf.mxu2  ;;  %v248_v30 = vpop.f32.mrf.mxu3 }
  0x95   :  { %v1544_v31 = vadd.f32 %v1533_v24, %v116_v29  ;;  %v101_v32 = vpop.f32.mrf.mxu0  ;;  %v1546_v33 = vpop.f32.mrf.mxu1  ;;  %v1557_v42 = vadd.f32 %v248_v30, %v203_v40 }
  0x96   :  { %v1549_v34 = vadd.f32 %v1533_v24, %v101_v32 }
  0x97   :  { %v272_v51 = vadd.f32 %v1557_v42, %v136_v26 }
  0x9c   :  { %v177_v35 = vpop.f32.mrf.mxu2  ;;  %v268_v36 = vpop.f32.mrf.mxu3 }
  0x9d   :  { %v104_v37 = vpop.f32.mrf.mxu0  ;;  %v1551_v38 = vpop.f32.mrf.mxu1  ;;  %v1564_v50 = vadd.f32 %v268_v36, %v204_v48 }
  0x9e   :  { %v1554_v39 = vadd.f32 %v1533_v24, %v104_v37 }
  0x9f   :  { %v273_v32 = vadd.f32 %v1564_v50, %v177_v35 }
  0xa4   :  { %v1559_v43 = vpop.f32.mrf.mxu2  ;;  %v312_v44 = vpop.f32.mrf.mxu3 }
  0xa5   :  { %v355_v45 = vadd.f32 %v312_v44, %v271_v41  ;;  %v145_v46 = vpop.f32.mrf.mxu1 }
  0xa6   :  { %v1562_v47 = vadd.f32 %v1557_v42, %v145_v46 }
  0xa7   :  { %v1268_v49 = vmul.f32 -1.442695, %v355_v45 }
  0xa9   :  { %1319 = vpow2.f32 %v1268_v49 }
  0xac   :  { %v183_v52 = vpop.f32.mrf.mxu2  ;;  %v332_v53 = vpop.f32.mrf.mxu3 }
  0xad   :  { %v1568_v54 = vadd.f32 %v1564_v50, %v183_v52  ;;  %v375_v55 = vadd.f32 %v332_v53, %v272_v51  ;;  %v148_v56 = vpop.f32.mrf.mxu1 }
  0xae   :  { %v1571_v57 = vadd.f32 %v1557_v42, %v148_v56 }
  0xaf   :  { %v1320_v58 = vpop.eup %1319  ;;  %v1269_v59 = vmul.f32 -1.442695, %v375_v55 }
  0xb0   :  { %v359_v60 = vadd.f32 1.0, %v1320_v58 }
  0xb1   :  { %1321 = vpow2.f32 %v1269_v59 }
  0xb2   :  { %1323 = vrcp.f32 %v359_v60  ;;  %v371_v12 = vand.u32 2147483648, %v359_v60  ;;  %v369_v17 = vand.u32 2147483647, %v359_v60  ;;  %vm365_vm2 = vweird.f32 %v359_v60 }
  0xb4   :  { %v186_v61 = vpop.f32.mrf.mxu2  ;;  %v352_v9 = vpop.f32.mrf.mxu3  ;;  %v372_v22 = vor.u32 1.1754944e-38, %v371_v12  ;;  %vm370_vm4 = vcmp.eq.f32.partialorder %v369_v17, 8.507059e+37 }
  0xb5   :  { %v1574_v62 = vadd.f32 %v1564_v50, %v186_v61  ;;  %v151_v63 = vpop.f32.mrf.mxu1  ;;  %v395_v20 = vadd.f32 %v352_v9, %v1579_v8  ;;  %v1611_v12 = vpop.f32.mrf.mxu0 }
  0xb6   :  { %v1577_v0 = vadd.f32 %v1557_v42, %v151_v63 }
  0xb7   :  { %v1322_v1 = vpop.eup %1321 }
  0xb8   :  { %v1324_v2 = vpop.eup %1323  ;;  %v379_v3 = vadd.f32 1.0, %v1322_v1 }
  0xb9   :  { %v361_v4 = vmul.f32 %v1324_v2, %v359_v60  ;;  %vm366_vm1 = vweird.f32 %v1324_v2 }
  0xba   :  { %1325 = vrcp.f32 %v379_v3  ;;  %vm367_vm3 = vmor %vm365_vm2, %vm366_vm1  ;;  %v389_v37 = vand.u32 2147483647, %v379_v3  ;;  %v391_v40 = vand.u32 2147483648, %v379_v3  ;;  %vm385_vm6 = vweird.f32 %v379_v3 }
  0xbb   :  { %v362_v6 = vsub.f32 1.0, %v361_v4 }
  0xbc   :  { %v189_v7 = vpop.f32.mrf.mxu2  ;;  %v392_v49 = vor.u32 1.1754944e-38, %v391_v40  ;;  %vm390_vm8 = vcmp.eq.f32.partialorder %v389_v37, 8.507059e+37  ;;  %v276_v40 = vadd.f32 %v1564_v50, %v1559_v43 }
  0xbd   :  { %v1582_v13 = vadd.f32 %v1564_v50, %v189_v7  ;;  %v154_v15 = vpop.f32.mrf.mxu1  ;;  %v363_v16 = vmul.f32 %v1324_v2, %v362_v6 }
  0xbe   :  { %v1585_v18 = vadd.f32 %v1557_v42, %v154_v15 }
  0xbf   :  { %v364_v19 = vadd.f32 %v1324_v2, %v363_v16 }
  0xc0   :  { %v1326_v21 = vpop.eup %1325 }
  0xc1   :  { %v381_v23 = vmul.f32 %v1326_v21, %v379_v3  ;;  %v368_v26 = vsel %vm367_vm3, %v1324_v2, %v364_v19  ;;  %vm386_vm5 = vweird.f32 %v1326_v21  ;;  %v275_v2 = vadd.f32 %v1557_v42, %v1546_v33 }
  0xc2   :  { %v373_v29 = vsel %vm370_vm4, %v372_v22, %v368_v26  ;;  %vm387_vm7 = vmor %vm385_vm6, %vm386_vm5 }
  0xc3   :  { %v382_v30 = vsub.f32 1.0, %v381_v23  ;;  %v396_v36 = vmul.f32 %v395_v20, %v373_v29 }
  0xc4   :  { %v192_v41 = vpop.f32.mrf.mxu2 }
  0xc5   :  { %v383_v44 = vmul.f32 %v1326_v21, %v382_v30  ;;  %v397_v45 = vadd.f32 %v396_v36, %v273_v32  ;;  %v1590_v46 = vadd.f32 %v1564_v50, %v192_v41 }
  0xc7   :  { %v384_v48 = vadd.f32 %v1326_v21, %v383_v44  ;;  %1327 = vtanh.f32 %v397_v45 }
  0xc9   :  { %v388_v51 = vsel %vm387_vm7, %v1326_v21, %v384_v48 }
  0xca   :  { %v393_v52 = vsel %vm390_vm8, %v392_v49, %v388_v51 }
  0xcb   :  { %v399_v53 = vsub.f32 1.0, %v393_v52  ;;  %v401_v59 = vmul.f32 %v393_v52, %v1463_v5  ;;  %v274_v5 = vadd.f32 %v1533_v24, %v1535_v25 }
  0xcc   :  { %v195_v35 = vpop.f32.mrf.mxu2 }
  0xcd   :  { %v1328_v55 = vpop.eup %1327  ;;  %v1593_v56 = vadd.f32 %v1564_v50, %v195_v35 }
  0xce   :  { %v400_v58 = vmul.f32 %v1328_v55, %v399_v53 }
  0xd0   :  { %v1596_v60 = vadd.f32 %v401_v59, %v400_v58 }
  0xd2   :  { %1270 = vmatmul.msk.f32.vlgmr.msra.gmra.mxu3 %vm53_vm0, %v1596_v60  ;;  %1272 = vmatmul.msk.f32.vlgmr.msrb.gmra.mxu0 %vm53_vm0, %v1596_v60 }
  0xd3   :  { %572 = vmatpush.msra.mxu3 %v1487_v14  ;;  %774 = vmatpush.msrb.mxu0 %v1472_v11 }
  0xda   :  { %1271 = vmatmul.msk.f32.vlgmr.msrb.gmra.mxu3 %vm53_vm0, %v1596_v60 }
  0xdb   :  { %754 = vmatpush.msrb.mxu3 %v1470_v10 }
 0x14f   :  { %v463_v33 = vpop.f32.mrf.mxu0 }
 0x150   :  { %v506_v30 = vadd.f32 %v463_v33, %v1579_v8 }
 0x155   :  { %v423_v61 = vpop.f32.mrf.mxu3 }
 0x156   :  { %v466_v63 = vadd.f32 %v423_v61, %v274_v5 }
 0x158   :  { %v1273_v1 = vmul.f32 -1.442695, %v466_v63  ;;  %v1628_v63 = vpop.f32.mrf.mxu1 }
 0x15a   :  { %1329 = vpow2.f32 %v1273_v1  ;;  %v1630_v1 = vpop.f32.mrf.mxu2 }
 0x15d   :  { %v443_v3 = vpop.f32.mrf.mxu3 }
 0x15e   :  { %v486_v4 = vadd.f32 %v443_v3, %v275_v2 }
 0x160   :  { %v1330_v6 = vpop.eup %1329  ;;  %v1274_v7 = vmul.f32 -1.442695, %v486_v4 }
 0x161   :  { %v470_v9 = vadd.f32 1.0, %v1330_v6  ;;  %v278_v6 = vadd.f32 %v1557_v42, %v1551_v38 }
 0x162   :  { %1331 = vpow2.f32 %v1274_v7 }
 0x163   :  { %1333 = vrcp.f32 %v470_v9  ;;  %v482_v20 = vand.u32 2147483648, %v470_v9  ;;  %v480_v22 = vand.u32 2147483647, %v470_v9  ;;  %vm476_vm10 = vweird.f32 %v470_v9 }
 0x165   :  { %v483_v29 = vor.u32 1.1754944e-38, %v482_v20  ;;  %vm481_vm12 = vcmp.eq.f32.partialorder %v480_v22, 8.507059e+37 }
 0x168   :  { %v1332_v15 = vpop.eup %1331 }
 0x169   :  { %v1334_v16 = vpop.eup %1333  ;;  %v490_v17 = vadd.f32 1.0, %v1332_v15 }
 0x16a   :  { %v472_v25 = vmul.f32 %v1334_v16, %v470_v9  ;;  %vm477_vm9 = vweird.f32 %v1334_v16 }
 0x16b   :  { %1335 = vrcp.f32 %v490_v17  ;;  %vm478_vm11 = vmor %vm476_vm10, %vm477_vm9  ;;  %v502_v45 = vand.u32 2147483648, %v490_v17  ;;  %v500_v49 = vand.u32 2147483647, %v490_v17  ;;  %vm496_vm14 = vweird.f32 %v490_v17 }
 0x16c   :  { %v473_v19 = vsub.f32 1.0, %v472_v25 }
 0x16d   :  { %v503_v53 = vor.u32 1.1754944e-38, %v502_v45  ;;  %vm501_vm1 = vcmp.eq.f32.partialorder %v500_v49, 8.507059e+37 }
 0x16e   :  { %v474_v21 = vmul.f32 %v1334_v16, %v473_v19 }
 0x170   :  { %v475_v23 = vadd.f32 %v1334_v16, %v474_v21 }
 0x171   :  { %v1336_v26 = vpop.eup %1335 }
 0x172   :  { %v479_v32 = vsel %vm478_vm11, %v1334_v16, %v475_v23  ;;  %v492_v36 = vmul.f32 %v1336_v26, %v490_v17  ;;  %vm497_vm13 = vweird.f32 %v1336_v26 }
 0x173   :  { %v484_v37 = vsel %vm481_vm12, %v483_v29, %v479_v32  ;;  %vm498_vm15 = vmor %vm496_vm14, %vm497_vm13 }
 0x174   :  { %v507_v41 = vmul.f32 %v506_v30, %v484_v37  ;;  %v493_v44 = vsub.f32 1.0, %v492_v36 }
 0x176   :  { %v494_v48 = vmul.f32 %v1336_v26, %v493_v44  ;;  %v508_v51 = vadd.f32 %v507_v41, %v276_v40 }
 0x178   :  { %v495_v52 = vadd.f32 %v1336_v26, %v494_v48  ;;  %1337 = vtanh.f32 %v508_v51 }
 0x17a   :  { %v499_v35 = vsel %vm498_vm15, %v1336_v26, %v495_v52 }
 0x17b   :  { %v504_v55 = vsel %vm501_vm1, %v503_v53, %v499_v35 }
 0x17c   :  { %v510_v58 = vsub.f32 1.0, %v504_v55  ;;  %v512_v43 = vmul.f32 %v504_v55, %v1596_v60 }
 0x17e   :  { %v1338_v59 = vpop.eup %1337 }
 0x17f   :  { %v511_v5 = vmul.f32 %v1338_v59, %v510_v58 }
 0x181   :  { %v1617_v61 = vadd.f32 %v512_v43, %v511_v5 }
 0x183   :  { %1275 = vmatmul.msk.f32.vlgmr.msra.gmra.mxu1 %vm53_vm0, %v1617_v61  ;;  %1276 = vmatmul.msk.f32.vlgmr.msra.gmra.mxu2 %vm53_vm0, %v1617_v61 }
 0x184   :  { %1277 = vmatmul.msk.f32.vlgmr.msra.gmra.mxu3 %vm53_vm0, %v1617_v61  ;;  %794 = vmatpush.msra.mxu1 %v1487_v14 }
 0x185   :  { %865 = vmatpush.msra.mxu2 %v1470_v10  ;;  %885 = vmatpush.msra.mxu3 %v1472_v11 }
 0x200   :  { %v534_v2 = vpop.f32.mrf.mxu1 }
 0x201   :  { %v577_v3 = vadd.f32 %v534_v2, %v1549_v34 }
 0x203   :  { %v1278_v4 = vmul.f32 -1.442695, %v577_v3 }
 0x205   :  { %1339 = vpow2.f32 %v1278_v4 }
 0x206   :  { %v554_v7 = vpop.f32.mrf.mxu2 }
 0x207   :  { %v597_v9 = vadd.f32 %v554_v7, %v278_v6  ;;  %v574_v38 = vpop.f32.mrf.mxu3 }
 0x208   :  { %v617_v40 = vadd.f32 %v574_v38, %v1579_v8 }
 0x209   :  { %v1279_v15 = vmul.f32 -1.442695, %v597_v9 }
 0x20b   :  { %v1340_v16 = vpop.eup %1339  ;;  %1341 = vpow2.f32 %v1279_v15 }
 0x20c   :  { %v581_v17 = vadd.f32 1.0, %v1340_v16 }
 0x20e   :  { %1343 = vrcp.f32 %v581_v17  ;;  %v593_v33 = vand.u32 2147483648, %v581_v17  ;;  %v591_v23 = vand.u32 2147483647, %v581_v17  ;;  %vm587_vm3 = vweird.f32 %v581_v17 }
 0x210   :  { %v594_v32 = vor.u32 1.1754944e-38, %v593_v33  ;;  %vm592_vm5 = vcmp.eq.f32.partialorder %v591_v23, 8.507059e+37 }
 0x211   :  { %v1342_v25 = vpop.eup %1341 }
 0x212   :  { %v601_v19 = vadd.f32 1.0, %v1342_v25 }
 0x214   :  { %v1344_v20 = vpop.eup %1343  ;;  %1345 = vrcp.f32 %v601_v19  ;;  %v613_v45 = vand.u32 2147483648, %v601_v19  ;;  %v611_v49 = vand.u32 2147483647, %v601_v19  ;;  %vm607_vm7 = vweird.f32 %v601_v19 }
 0x215   :  { %v583_v21 = vmul.f32 %v1344_v20, %v581_v17  ;;  %vm588_vm2 = vweird.f32 %v1344_v20 }
 0x216   :  { %vm589_vm4 = vmor %vm587_vm3, %vm588_vm2  ;;  %v614_v53 = vor.u32 1.1754944e-38, %v613_v45  ;;  %vm612_vm9 = vcmp.eq.f32.partialorder %v611_v49, 8.507059e+37 }
 0x217   :  { %v584_v22 = vsub.f32 1.0, %v583_v21 }
 0x219   :  { %v585_v34 = vmul.f32 %v1344_v20, %v584_v22 }
 0x21a   :  { %v1346_v26 = vpop.eup %1345 }
 0x21b   :  { %v603_v29 = vmul.f32 %v1346_v26, %v601_v19  ;;  %v586_v30 = vadd.f32 %v1344_v20, %v585_v34  ;;  %vm608_vm6 = vweird.f32 %v1346_v26 }
 0x21c   :  { %vm609_vm8 = vmor %vm607_vm7, %vm608_vm6 }
 0x21d   :  { %v604_v36 = vsub.f32 1.0, %v603_v29  ;;  %v590_v37 = vsel %vm589_vm4, %v1344_v20, %v586_v30 }
 0x21e   :  { %v595_v41 = vsel %vm592_vm5, %v594_v32, %v590_v37 }
 0x21f   :  { %v605_v44 = vmul.f32 %v1346_v26, %v604_v36  ;;  %v618_v48 = vmul.f32 %v617_v40, %v595_v41 }
 0x221   :  { %v606_v51 = vadd.f32 %v1346_v26, %v605_v44  ;;  %v619_v52 = vadd.f32 %v618_v48, %v1568_v54 }
 0x223   :  { %v610_v35 = vsel %vm609_vm8, %v1346_v26, %v606_v51  ;;  %1347 = vtanh.f32 %v619_v52 }
 0x224   :  { %v615_v55 = vsel %vm612_vm9, %v614_v53, %v610_v35 }
 0x225   :  { %v621_v58 = vsub.f32 1.0, %v615_v55  ;;  %v623_v43 = vmul.f32 %v615_v55, %v1617_v61 }
 0x229   :  { %v1348_v59 = vpop.eup %1347 }
 0x22a   :  { %v622_v5 = vmul.f32 %v1348_v59, %v621_v58 }
 0x22c   :  { %v1638_v2 = vadd.f32 %v623_v43, %v622_v5 }
 0x22e   :  { %1280 = vmatmul.msk.f32.vlgmr.msra.gmra.mxu0 %vm53_vm0, %v1638_v2  ;;  %1281 = vmatmul.msk.f32.vlgmr.msrb.gmra.mxu1 %vm53_vm0, %v1638_v2 }
 0x22f   :  { %1282 = vmatmul.msk.f32.vlgmr.msrb.gmra.mxu2 %vm53_vm0, %v1638_v2  ;;  %905 = vmatpush.msra.mxu0 %v1487_v14 }
 0x230   :  { %976 = vmatpush.msrb.mxu1 %v1470_v10  ;;  %996 = vmatpush.msrb.mxu2 %v1472_v11 }
 0x2ab   :  { %v645_v54 = vpop.f32.mrf.mxu0  ;;  %v665_v3 = vpop.f32.mrf.mxu1 }
 0x2ac   :  { %v688_v4 = vadd.f32 %v645_v54, %v1554_v39  ;;  %v708_v6 = vadd.f32 %v665_v3, %v1562_v47  ;;  %v283_v54 = vadd.f32 %v1533_v24, %v1611_v12 }
 0x2ae   :  { %v1283_v7 = vmul.f32 -1.442695, %v688_v4  ;;  %v1284_v9 = vmul.f32 -1.442695, %v708_v6 }
 0x2b0   :  { %1349 = vpow2.f32 %v1283_v7 }
 0x2b1   :  { %1351 = vpow2.f32 %v1284_v9 }
 0x2b2   :  { %v685_v38 = vpop.f32.mrf.mxu2 }
 0x2b3   :  { %v728_v36 = vadd.f32 %v685_v38, %v1579_v8 }
 0x2b6   :  { %v1350_v15 = vpop.eup %1349 }
 0x2b7   :  { %v1352_v16 = vpop.eup %1351  ;;  %v692_v17 = vadd.f32 1.0, %v1350_v15 }
 0x2b8   :  { %v712_v25 = vadd.f32 1.0, %v1352_v16 }
 0x2b9   :  { %1353 = vrcp.f32 %v692_v17  ;;  %v704_v23 = vand.u32 2147483648, %v692_v17  ;;  %v702_v47 = vand.u32 2147483647, %v692_v17  ;;  %vm698_vm11 = vweird.f32 %v692_v17 }
 0x2ba   :  { %1355 = vrcp.f32 %v712_v25  ;;  %v724_v41 = vand.u32 2147483648, %v712_v25  ;;  %vm718_vm15 = vweird.f32 %v712_v25  ;;  %v722_v45 = vand.u32 2147483647, %v712_v25 }
 0x2bb   :  { %v705_v30 = vor.u32 1.1754944e-38, %v704_v23  ;;  %vm703_vm13 = vcmp.eq.f32.partialorder %v702_v47, 8.507059e+37 }
 0x2bc   :  { %v725_v51 = vor.u32 1.1754944e-38, %v724_v41  ;;  %vm723_vm2 = vcmp.eq.f32.partialorder %v722_v45, 8.507059e+37 }
 0x2bf   :  { %v1354_v19 = vpop.eup %1353 }
 0x2c0   :  { %v1356_v20 = vpop.eup %1355  ;;  %v694_v21 = vmul.f32 %v1354_v19, %v692_v17  ;;  %vm699_vm10 = vweird.f32 %v1354_v19 }
 0x2c1   :  { %v714_v22 = vmul.f32 %v1356_v20, %v712_v25  ;;  %vm700_vm12 = vmor %vm698_vm11, %vm699_vm10  ;;  %vm719_vm14 = vweird.f32 %v1356_v20 }
 0x2c2   :  { %v695_v33 = vsub.f32 1.0, %v694_v21  ;;  %vm720_vm1 = vmor %vm718_vm15, %vm719_vm14 }
 0x2c3   :  { %v715_v34 = vsub.f32 1.0, %v714_v22 }
 0x2c4   :  { %v696_v39 = vmul.f32 %v1354_v19, %v695_v33 }
 0x2c5   :  { %v716_v26 = vmul.f32 %v1356_v20, %v715_v34 }
 0x2c6   :  { %v697_v29 = vadd.f32 %v1354_v19, %v696_v39 }
 0x2c7   :  { %v717_v37 = vadd.f32 %v1356_v20, %v716_v26 }
 0x2c8   :  { %v701_v32 = vsel %vm700_vm12, %v1354_v19, %v697_v29 }
 0x2c9   :  { %v706_v40 = vsel %vm703_vm13, %v705_v30, %v701_v32  ;;  %v721_v49 = vsel %vm720_vm1, %v1356_v20, %v717_v37 }
 0x2ca   :  { %v729_v44 = vmul.f32 %v728_v36, %v706_v40  ;;  %v726_v52 = vsel %vm723_vm2, %v725_v51, %v721_v49 }
 0x2cb   :  { %v732_v53 = vsub.f32 1.0, %v726_v52  ;;  %v734_v58 = vmul.f32 %v726_v52, %v1638_v2 }
 0x2cc   :  { %v730_v48 = vadd.f32 %v729_v44, %v1574_v62 }
 0x2ce   :  { %1357 = vtanh.f32 %v730_v48 }
 0x2d4   :  { %v1358_v35 = vpop.eup %1357 }
 0x2d5   :  { %v733_v55 = vmul.f32 %v1358_v35, %v732_v53 }
 0x2d7   :  { %v1654_v59 = vadd.f32 %v734_v58, %v733_v55 }
 0x2d9   :  { %1285 = vmatmul.msk.f32.vlgmr.msrb.gmra.mxu3 %vm53_vm0, %v1654_v59  ;;  %1286 = vmatmul.msk.f32.vlgmr.msrb.gmra.mxu0 %vm53_vm0, %v1654_v59 }
 0x2da   :  { %1287 = vmatmul.msk.f32.vlgmr.msra.gmra.mxu1 %vm53_vm0, %v1654_v59  ;;  %1016 = vmatpush.msrb.mxu3 %v1487_v14 }
 0x2db   :  { %1087 = vmatpush.msrb.mxu0 %v1470_v10  ;;  %1107 = vmatpush.msra.mxu1 %v1472_v11 }
 0x356   :  { %v776_v62 = vpop.f32.mrf.mxu0 }
 0x357   :  { %v819_v5 = vadd.f32 %v776_v62, %v1571_v57  ;;  %v796_v22 = vpop.f32.mrf.mxu1 }
 0x358   :  { %v839_v23 = vadd.f32 %v796_v22, %v1579_v8 }
 0x359   :  { %v1289_v43 = vmul.f32 -1.442695, %v819_v5 }
 0x35b   :  { %1359 = vpow2.f32 %v1289_v43 }
 0x35c   :  { %v756_v3 = vpop.f32.mrf.mxu3 }
 0x35d   :  { %v799_v4 = vadd.f32 %v756_v3, %v283_v54  ;;  %v51_v54 = vld [vmem:[#allocation2 + $0x78] sm:$0xff] }
 0x35f   :  { %v1288_v6 = vmul.f32 -1.442695, %v799_v4 }
 0x361   :  { %v1360_v7 = vpop.eup %1359  ;;  %1361 = vpow2.f32 %v1288_v6 }
 0x362   :  { %v823_v9 = vadd.f32 1.0, %v1360_v7 }
 0x364   :  { %1363 = vrcp.f32 %v823_v9  ;;  %v835_v38 = vand.u32 2147483648, %v823_v9  ;;  %vm829_vm8 = vweird.f32 %v823_v9  ;;  %v833_v30 = vand.u32 2147483647, %v823_v9 }
 0x366   :  { %v836_v37 = vor.u32 1.1754944e-38, %v835_v38  ;;  %vm834_vm10 = vcmp.eq.f32.partialorder %v833_v30, 8.507059e+37 }
 0x367   :  { %v1362_v15 = vpop.eup %1361 }
 0x368   :  { %v803_v16 = vadd.f32 1.0, %v1362_v15 }
 0x36a   :  { %1365 = vrcp.f32 %v803_v16  ;;  %v1364_v10 = vpop.eup %1363  ;;  %v815_v20 = vand.u32 2147483648, %v803_v16  ;;  %v813_v24 = vand.u32 2147483647, %v803_v16  ;;  %vm809_vm4 = vweird.f32 %v803_v16 }
 0x36b   :  { %v825_v11 = vmul.f32 %v1364_v10, %v823_v9  ;;  %vm830_vm7 = vweird.f32 %v1364_v10 }
 0x36c   :  { %v816_v34 = vor.u32 1.1754944e-38, %v815_v20  ;;  %vm814_vm6 = vcmp.eq.f32.partialorder %v813_v24, 8.507059e+37  ;;  %vm831_vm9 = vmor %vm829_vm8, %vm830_vm7 }
 0x36d   :  { %v826_v57 = vsub.f32 1.0, %v825_v11 }
 0x36f   :  { %v827_v12 = vmul.f32 %v1364_v10, %v826_v57 }
 0x370   :  { %v1366_v17 = vpop.eup %1365 }
 0x371   :  { %v805_v25 = vmul.f32 %v1366_v17, %v803_v16  ;;  %vm810_vm3 = vweird.f32 %v1366_v17  ;;  %v828_v47 = vadd.f32 %v1364_v10, %v827_v12 }
 0x372   :  { %vm811_vm5 = vmor %vm809_vm4, %vm810_vm3 }
 0x373   :  { %v806_v19 = vsub.f32 1.0, %v805_v25  ;;  %v832_v36 = vsel %vm831_vm9, %v1364_v10, %v828_v47 }
 0x374   :  { %v837_v40 = vsel %vm834_vm10, %v836_v37, %v832_v36 }
 0x375   :  { %v807_v21 = vmul.f32 %v1366_v17, %v806_v19  ;;  %v843_v41 = vsub.f32 1.0, %v837_v40  ;;  %v845_v48 = vmul.f32 %v837_v40, %v1654_v59 }
 0x377   :  { %v808_v33 = vadd.f32 %v1366_v17, %v807_v21 }
 0x379   :  { %v812_v39 = vsel %vm811_vm5, %v1366_v17, %v808_v33 }
 0x37a   :  { %v817_v26 = vsel %vm814_vm6, %v816_v34, %v812_v39 }
 0x37b   :  { %v840_v29 = vmul.f32 %v839_v23, %v817_v26 }
 0x37d   :  { %v841_v32 = vadd.f32 %v840_v29, %v1582_v13 }
 0x37f   :  { %1367 = vtanh.f32 %v841_v32 }
 0x385   :  { %v1368_v44 = vpop.eup %1367 }
 0x386   :  { %v844_v45 = vmul.f32 %v1368_v44, %v843_v41 }
 0x388   :  { %v1671_v49 = vadd.f32 %v845_v48, %v844_v45  ;;  %v1691_v48 = vld [vmem:[#allocation2 + $0x90] ss:$0 sm:$0xff] }
 0x38a   :  { %1290 = vmatmul.msk.f32.vlgmr.msra.gmra.mxu2 %vm53_vm0, %v1671_v49  ;;  %1291 = vmatmul.msk.f32.vlgmr.msra.gmra.mxu3 %vm53_vm0, %v1671_v49 }
 0x38b   :  { %1292 = vmatmul.msk.f32.vlgmr.msra.gmra.mxu0 %vm53_vm0, %v1671_v49  ;;  %1127 = vmatpush.msra.mxu2 %v1487_v14 }
 0x38c   :  { %1315 = vmatpush.msra.mxu3 %v51_v54  ;;  %1198 = vmatpush.msra.mxu0 %v51_v54 }
 0x408   :  { %v907_v16 = vpop.f32.mrf.mxu0 }
 0x409   :  { %v950_v25 = vadd.f32 %v907_v16, %v1579_v8 }
 0x40d   :  { %v867_v13 = vpop.f32.mrf.mxu2  ;;  %v887_v51 = vpop.f32.mrf.mxu3 }
 0x40e   :  { %v910_v52 = vadd.f32 %v867_v13, %v1538_v27  ;;  %v930_v53 = vadd.f32 %v887_v51, %v1577_v0 }
 0x410   :  { %v1293_v35 = vmul.f32 -1.442695, %v910_v52  ;;  %v1294_v55 = vmul.f32 -1.442695, %v930_v53 }
 0x412   :  { %1369 = vpow2.f32 %v1293_v35 }
 0x413   :  { %1371 = vpow2.f32 %v1294_v55 }
 0x418   :  { %v1370_v58 = vpop.eup %1369 }
 0x419   :  { %v1372_v62 = vpop.eup %1371  ;;  %v914_v5 = vadd.f32 1.0, %v1370_v58 }
 0x41a   :  { %v934_v43 = vadd.f32 1.0, %v1372_v62 }
 0x41b   :  { %1373 = vrcp.f32 %v914_v5  ;;  %v926_v7 = vand.u32 2147483648, %v914_v5  ;;  %v924_v15 = vand.u32 2147483647, %v914_v5  ;;  %vm920_vm12 = vweird.f32 %v914_v5 }
 0x41c   :  { %1375 = vrcp.f32 %v934_v43  ;;  %v946_v24 = vand.u32 2147483648, %v934_v43  ;;  %vm940_vm1 = vweird.f32 %v934_v43  ;;  %v944_v12 = vand.u32 2147483647, %v934_v43 }
 0x41d   :  { %v927_v17 = vor.u32 1.1754944e-38, %v926_v7  ;;  %vm925_vm14 = vcmp.eq.f32.partialorder %v924_v15, 8.507059e+37 }
 0x41e   :  { %v947_v34 = vor.u32 1.1754944e-38, %v946_v24  ;;  %vm945_vm3 = vcmp.eq.f32.partialorder %v944_v12, 8.507059e+37 }
 0x421   :  { %v1374_v14 = vpop.eup %1373 }
 0x422   :  { %v1376_v3 = vpop.eup %1375  ;;  %v916_v4 = vmul.f32 %v1374_v14, %v914_v5  ;;  %vm921_vm11 = vweird.f32 %v1374_v14 }
 0x423   :  { %v936_v6 = vmul.f32 %v1376_v3, %v934_v43  ;;  %vm922_vm13 = vmor %vm920_vm12, %vm921_vm11  ;;  %vm941_vm15 = vweird.f32 %v1376_v3 }
 0x424   :  { %v917_v27 = vsub.f32 1.0, %v916_v4  ;;  %vm942_vm2 = vmor %vm940_vm1, %vm941_vm15 }
 0x425   :  { %v937_v0 = vsub.f32 1.0, %v936_v6 }
 0x426   :  { %v918_v9 = vmul.f32 %v1374_v14, %v917_v27 }
 0x427   :  { %v938_v10 = vmul.f32 %v1376_v3, %v937_v0 }
 0x428   :  { %v919_v11 = vadd.f32 %v1374_v14, %v918_v9 }
 0x429   :  { %v939_v20 = vadd.f32 %v1376_v3, %v938_v10 }
 0x42a   :  { %v923_v57 = vsel %vm922_vm13, %v1374_v14, %v919_v11 }
 0x42b   :  { %v928_v19 = vsel %vm925_vm14, %v927_v17, %v923_v57  ;;  %v943_v33 = vsel %vm942_vm2, %v1376_v3, %v939_v20 }
 0x42c   :  { %v951_v21 = vmul.f32 %v950_v25, %v928_v19  ;;  %v948_v23 = vsel %vm945_vm3, %v947_v34, %v943_v33 }
 0x42d   :  { %v954_v39 = vsub.f32 1.0, %v948_v23  ;;  %v956_v38 = vmul.f32 %v948_v23, %v1671_v49 }
 0x42e   :  { %v952_v22 = vadd.f32 %v951_v21, %v1590_v46 }
 0x430   :  { %1377 = vtanh.f32 %v952_v22 }
 0x436   :  { %v1378_v47 = vpop.eup %1377 }
 0x437   :  { %v955_v26 = vmul.f32 %v1378_v47, %v954_v39 }
 0x439   :  { %v957_v29 = vadd.f32 %v956_v38, %v955_v26 }
 0x43b   :  { %1295 = vmatmul.msk.f32.vlgmr.msrb.gmra.mxu1 %vm53_vm0, %v957_v29  ;;  %1296 = vmatmul.msk.f32.vlgmr.msrb.gmra.mxu2 %vm53_vm0, %v957_v29 }
 0x43c   :  { %1297 = vmatmul.msk.f32.vlgmr.msrb.gmra.mxu3 %vm53_vm0, %v957_v29 }
 0x444   :  { %1310 = vmatmul.msk.f32.vlgmr.msra.gmra.mxu3 %vm53_vm0, %v957_v29 }
 0x4b8   :  { %v978_v46 = vpop.f32.mrf.mxu1 }
 0x4b9   :  { %v1021_v30 = vadd.f32 %v978_v46, %v1541_v28 }
 0x4bb   :  { %v1298_v32 = vmul.f32 -1.442695, %v1021_v30 }
 0x4bd   :  { %1379 = vpow2.f32 %v1298_v32 }
 0x4be   :  { %v998_v36 = vpop.f32.mrf.mxu2 }
 0x4bf   :  { %v1041_v37 = vadd.f32 %v998_v36, %v1585_v18  ;;  %v1018_v40 = vpop.f32.mrf.mxu3 }
 0x4c0   :  { %v1061_v6 = vadd.f32 %v1018_v40, %v1579_v8 }
 0x4c1   :  { %v1299_v41 = vmul.f32 -1.442695, %v1041_v37 }
 0x4c3   :  { %v1380_v44 = vpop.eup %1379  ;;  %1381 = vpow2.f32 %v1299_v41 }
 0x4c4   :  { %v1025_v45 = vadd.f32 1.0, %v1380_v44 }
 0x4c6   :  { %1383 = vrcp.f32 %v1025_v45  ;;  %v1037_v55 = vand.u32 2147483648, %v1025_v45  ;;  %v1035_v62 = vand.u32 2147483647, %v1025_v45  ;;  %vm1031_vm5 = vweird.f32 %v1025_v45 }
 0x4c7   :  { %v1215_v13 = vpop.f32.mrf.mxu3 }
 0x4c8   :  { %v1216_v51 = vadd.f32 %v1215_v13, %v1691_v48  ;;  %v1038_v14 = vor.u32 1.1754944e-38, %v1037_v55  ;;  %vm1036_vm7 = vcmp.eq.f32.partialorder %v1035_v62, 8.507059e+37 }
 0x4c9   :  { %v1382_v52 = vpop.eup %1381 }
 0x4ca   :  { %v1045_v53 = vadd.f32 1.0, %v1382_v52  ;;  %1229 = vst [vmem:[%s1762_s3 + $0x28] sm:$0xff] %v1216_v51 }
 0x4cc   :  { %v1384_v28 = vpop.eup %1383  ;;  %1385 = vrcp.f32 %v1045_v53  ;;  %v1057_v0 = vand.u32 2147483648, %v1045_v53  ;;  %v1055_v15 = vand.u32 2147483647, %v1045_v53  ;;  %vm1051_vm9 = vweird.f32 %v1045_v53 }
 0x4cd   :  { %v1027_v18 = vmul.f32 %v1384_v28, %v1025_v45  ;;  %vm1032_vm4 = vweird.f32 %v1384_v28 }
 0x4ce   :  { %vm1033_vm6 = vmor %vm1031_vm5, %vm1032_vm4  ;;  %v1058_v11 = vor.u32 1.1754944e-38, %v1057_v0  ;;  %vm1056_vm11 = vcmp.eq.f32.partialorder %v1055_v15, 8.507059e+37 }
 0x4cf   :  { %v1028_v35 = vsub.f32 1.0, %v1027_v18 }
 0x4d1   :  { %v1029_v58 = vmul.f32 %v1384_v28, %v1028_v35 }
 0x4d2   :  { %v1386_v5 = vpop.eup %1385 }
 0x4d3   :  { %v1047_v43 = vmul.f32 %v1386_v5, %v1045_v53  ;;  %v1030_v54 = vadd.f32 %v1384_v28, %v1029_v58  ;;  %vm1052_vm8 = vweird.f32 %v1386_v5  ;;  %v294_v58 = vadd.f32 %v1564_v50, %v1630_v1 }
 0x4d4   :  { %vm1053_vm10 = vmor %vm1051_vm9, %vm1052_vm8 }
 0x4d5   :  { %v1048_v3 = vsub.f32 1.0, %v1047_v43  ;;  %v1034_v4 = vsel %vm1033_vm6, %v1384_v28, %v1030_v54 }
 0x4d6   :  { %v1039_v27 = vsel %vm1036_vm7, %v1038_v14, %v1034_v4 }
 0x4d7   :  { %v1049_v7 = vmul.f32 %v1386_v5, %v1048_v3  ;;  %v1062_v9 = vmul.f32 %v1061_v6, %v1039_v27 }
 0x4d9   :  { %v1050_v16 = vadd.f32 %v1386_v5, %v1049_v7  ;;  %v1063_v10 = vadd.f32 %v1062_v9, %v1593_v56  ;;  %v293_v56 = vadd.f32 %v1557_v42, %v1628_v63 }
 0x4db   :  { %v1054_v17 = vsel %vm1053_vm10, %v1386_v5, %v1050_v16  ;;  %1387 = vtanh.f32 %v1063_v10 }
 0x4dc   :  { %v1059_v25 = vsel %vm1056_vm11, %v1058_v11, %v1054_v17 }
 0x4dd   :  { %v1065_v57 = vsub.f32 1.0, %v1059_v25  ;;  %v1067_v21 = vmul.f32 %v1059_v25, %v957_v29 }
 0x4e1   :  { %v1388_v19 = vpop.eup %1387 }
 0x4e2   :  { %v1066_v20 = vmul.f32 %v1388_v19, %v1065_v57 }
 0x4e4   :  { %v1699_v24 = vadd.f32 %v1067_v21, %v1066_v20 }
 0x4e6   :  { %1300 = vmatmul.msk.f32.vlgmr.msrb.gmra.mxu0 %vm53_vm0, %v1699_v24  ;;  %1301 = vmatmul.msk.f32.vlgmr.msra.gmra.mxu1 %vm53_vm0, %v1699_v24 }
 0x4e7   :  { %1302 = vmatmul.msk.f32.vlgmr.msra.gmra.mxu2 %vm53_vm0, %v1699_v24  ;;  %1311 = vmatmul.msk.f32.gmra.mxu3 %vm53_vm0, %v1699_v24 }
 0x4ee   :  { %1305 = vmatmul.msk.f32.vlgmr.msra.gmra.mxu0 %vm53_vm0, %v1596_v60 }
 0x4f6   :  { %1306 = vmatmul.msk.f32.gmra.mxu0 %vm53_vm0, %v1617_v61 }
 0x4fe   :  { %1307 = vmatmul.msk.f32.gmra.mxu0 %vm53_vm0, %v1638_v2 }
 0x506   :  { %1308 = vmatmul.msk.f32.gmra.mxu0 %vm53_vm0, %v1654_v59 }
 0x50e   :  { %1309 = vmatmul.msk.f32.gmra.mxu0 %vm53_vm0, %v1671_v49 }
 0x563   :  { %v1089_v12 = vpop.f32.mrf.mxu0  ;;  %v1109_v22 = vpop.f32.mrf.mxu1 }
 0x564   :  { %v1132_v33 = vadd.f32 %v1089_v12, %v1544_v31  ;;  %v1152_v60 = vadd.f32 %v1109_v22, %v293_v56 }
 0x566   :  { %v1303_v34 = vmul.f32 -1.442695, %v1132_v33  ;;  %v1304_v23 = vmul.f32 -1.442695, %v1152_v60 }
 0x568   :  { %1389 = vpow2.f32 %v1303_v34 }
 0x569   :  { %1391 = vpow2.f32 %v1304_v23 }
 0x56a   :  { %v1218_v61 = vpop.f32.mrf.mxu3  ;;  %v1129_v13 = vpop.f32.mrf.mxu2 }
 0x56b   :  { %v1219_v2 = vadd.f32 %v1218_v61, %v1691_v48  ;;  %v1200_v39 = vpop.f32.mrf.mxu0  ;;  %v1172_v18 = vadd.f32 %v1129_v13, %v1579_v8 }
 0x56c   :  { %v1201_v59 = vadd.f32 %v1200_v39, %v1691_v48 }
 0x56d   :  { %1230 = vst [vmem:[%s1762_s3 + $0x30] sm:$0xff] %v1219_v2 }
 0x56e   :  { %v1390_v42 = vpop.eup %1389  ;;  %1224 = vst [vmem:[%s1762_s3] sm:$0xff] %v1201_v59 }
 0x56f   :  { %v1392_v31 = vpop.eup %1391  ;;  %v1136_v63 = vadd.f32 1.0, %v1390_v42 }
 0x570   :  { %v1156_v49 = vadd.f32 1.0, %v1392_v31 }
 0x571   :  { %1393 = vrcp.f32 %v1136_v63  ;;  %v1148_v37 = vand.u32 2147483648, %v1136_v63  ;;  %v1146_v44 = vand.u32 2147483647, %v1136_v63  ;;  %vm1142_vm13 = vweird.f32 %v1136_v63 }
 0x572   :  { %1395 = vrcp.f32 %v1156_v49  ;;  %v1168_v5 = vand.u32 2147483648, %v1156_v49  ;;  %vm1162_vm2 = vweird.f32 %v1156_v49  ;;  %v1166_v54 = vand.u32 2147483647, %v1156_v49 }
 0x573   :  { %v1203_v47 = vpop.f32.mrf.mxu0  ;;  %v1149_v53 = vor.u32 1.1754944e-38, %v1148_v37  ;;  %vm1147_vm15 = vcmp.eq.f32.partialorder %v1146_v44, 8.507059e+37 }
 0x574   :  { %v1204_v26 = vadd.f32 %v1203_v47, %v1691_v48  ;;  %v1169_v8 = vor.u32 1.1754944e-38, %v1168_v5  ;;  %vm1167_vm4 = vcmp.eq.f32.partialorder %v1166_v54, 8.507059e+37 }
 0x576   :  { %1225 = vst [vmem:[%s1762_s3 + $0x8] sm:$0xff] %v1204_v26 }
 0x577   :  { %v1394_v38 = vpop.eup %1393 }
 0x578   :  { %v1396_v29 = vpop.eup %1395  ;;  %v1138_v46 = vmul.f32 %v1394_v38, %v1136_v63  ;;  %vm1143_vm12 = vweird.f32 %v1394_v38 }
 0x579   :  { %v1158_v30 = vmul.f32 %v1396_v29, %v1156_v49  ;;  %vm1144_vm14 = vmor %vm1142_vm13, %vm1143_vm12  ;;  %vm1163_vm1 = vweird.f32 %v1396_v29 }
 0x57a   :  { %v1139_v32 = vsub.f32 1.0, %v1138_v46  ;;  %vm1164_vm3 = vmor %vm1162_vm2, %vm1163_vm1 }
 0x57b   :  { %v1159_v36 = vsub.f32 1.0, %v1158_v30  ;;  %v1206_v40 = vpop.f32.mrf.mxu0 }
 0x57c   :  { %v1140_v41 = vmul.f32 %v1394_v38, %v1139_v32  ;;  %v1207_v45 = vadd.f32 %v1206_v40, %v1691_v48 }
 0x57d   :  { %v1160_v51 = vmul.f32 %v1396_v29, %v1159_v36 }
 0x57e   :  { %v1141_v52 = vadd.f32 %v1394_v38, %v1140_v41  ;;  %1226 = vst [vmem:[%s1762_s3 + $0x10] sm:$0xff] %v1207_v45 }
 0x57f   :  { %v1161_v55 = vadd.f32 %v1396_v29, %v1160_v51 }
 0x580   :  { %v1145_v28 = vsel %vm1144_vm14, %v1394_v38, %v1141_v52 }
 0x581   :  { %v1150_v35 = vsel %vm1147_vm15, %v1149_v53, %v1145_v28  ;;  %v1165_v4 = vsel %vm1164_vm3, %v1396_v29, %v1161_v55 }
 0x582   :  { %v1173_v62 = vmul.f32 %v1172_v18, %v1150_v35  ;;  %v1170_v6 = vsel %vm1167_vm4, %v1169_v8, %v1165_v4 }
 0x583   :  { %v1209_v43 = vpop.f32.mrf.mxu0  ;;  %v1176_v50 = vsub.f32 1.0, %v1170_v6  ;;  %v1178_v9 = vmul.f32 %v1170_v6, %v1699_v24 }
 0x584   :  { %v1174_v14 = vadd.f32 %v1173_v62, %v294_v58  ;;  %v1210_v3 = vadd.f32 %v1209_v43, %v1691_v48 }
 0x586   :  { %1397 = vtanh.f32 %v1174_v14  ;;  %1227 = vst [vmem:[%s1762_s3 + $0x18] sm:$0xff] %v1210_v3 }
 0x58b   :  { %v1212_v27 = vpop.f32.mrf.mxu0 }
 0x58c   :  { %v1398_v1 = vpop.eup %1397  ;;  %v1213_v7 = vadd.f32 %v1212_v27, %v1691_v48 }
 0x58d   :  { %v1177_v0 = vmul.f32 %v1398_v1, %v1176_v50 }
 0x58e   :  { %1228 = vst [vmem:[%s1762_s3 + $0x20] sm:$0xff] %v1213_v7 }
 0x58f   :  { %v1179_v15 = vadd.f32 %v1178_v9, %v1177_v0 }
 0x591   :  { %1312 = vmatmul.msk.f32.gmra.mxu3 %vm53_vm0, %v1179_v15  ;;  %1232 = vst.msk [vmem:[%s1762_s3 + $0x40] sm:$0xff] %vm53_vm0, %v1179_v15 }
 0x614   :  { %v1221_v16 = vpop.f32.mrf.mxu3 }
 0x615   :  { %v1222_v10 = vadd.f32 %v1221_v16, %v1691_v48 }
 0x617   :  { %1231 = vst [vmem:[%s1762_s3 + $0x38] sm:$0xff] %v1222_v10 }
 0x618   :  { %1237 = vsyncpa [#allocation3], 1 }

</bundles_post_ra>
